<compile_context>
chip_gen: v7x
topology: tpu7x:2x2x1
jax: 0.10.0
libtpu: 0.0.40
codegen_flags: <defaults>
</compile_context>

<pallas_src>
import functools

import numpy as np
import jax
import jax.numpy as jnp
from jax.experimental import pallas as pl
from jax.experimental.pallas import tpu as pltpu

# ---------------- module configuration ----------------
NUM_FREQS = 6
FREQ_FACTOR = 1.5
NUM_LINEAR_LAYERS = 2
EMBED_DIM = 128                                   # must stay a multiple of 128
D_IN = 3
PE_DOUT = NUM_FREQS * 2 * D_IN + D_IN             # 39 (include_input=True)
FEAT_DIM = PE_DOUT + 3                            # 42 = pos-enc(cam_center) ++ direction
FEAT_PAD = 128                                    # lane-padded feature width
CIN_PAD = 16                                      # compact input lanes: cc_hi(3) cc_lo(3) dir(3) pad(7)
TBL_ROWS = 24                                     # rows 0..2 freq/phase/mask, rows 8..23 scatter matrix
TM_MAX = 256                                      # max rows per grid step (full v6e MXU pass)
OUT_DIM = EMBED_DIM if NUM_LINEAR_LAYERS > 0 else FEAT_DIM
OUT_PAD = EMBED_DIM if NUM_LINEAR_LAYERS > 0 else FEAT_PAD


# ---------------- Pallas kernel ----------------
def _embedder_kernel(num_layers, compact_ref, tbl_ref, *rest):
    """rest = [w0, b0, w1, b1, ...] followed by the output ref."""
    *wb_refs, o_ref = rest

    freq = tbl_ref[0:1, :]                         # (1, FEAT_PAD)
    phase = tbl_ref[1:2, :]
    mask = tbl_ref[2:3, :]
    scatter = tbl_ref[8:8 + CIN_PAD, :]            # (CIN_PAD, FEAT_PAD) 0/1 layout matrix

    # Expand the compact 16-lane camera slab to the 42-lane feature layout
    # [cam_center | cam_center tiled x12 | direction | 0-pad] with one small MXU matmul.
    raw = jnp.dot(compact_ref[...], scatter, preferred_element_type=jnp.float32)

    # Positional encoding: sin(phase + x * freq) on the 36 trig lanes, passthrough
    # (cam_center / direction) on the remaining lanes.
    trig = jnp.sin(phase + raw * freq)
    x = jnp.where(mask > 0, trig, raw)             # (tm, FEAT_PAD) == concat features

    for l in range(num_layers):
        w = wb_refs[2 * l][...]
        b = wb_refs[2 * l + 1][...]
        x = jnp.dot(x, w, preferred_element_type=jnp.float32) + b
        x = jnp.maximum(x, 0.0)                    # nn.ReLU()

    o_ref[...] = x


# ---------------- parameter init (deterministic, synthetic) ----------------
def init_params(key):
    params = []
    in_dims = [FEAT_DIM] + [EMBED_DIM] * max(NUM_LINEAR_LAYERS - 1, 0)
    in_pads = [FEAT_PAD] + [EMBED_DIM] * max(NUM_LINEAR_LAYERS - 1, 0)
    for i in range(NUM_LINEAR_LAYERS):
        key, kw, kb = jax.random.split(key, 3)
        w = jax.random.normal(kw, (in_dims[i], EMBED_DIM), jnp.float32) / jnp.sqrt(
            jnp.float32(in_dims[i]))
        b = jax.random.normal(kb, (1, EMBED_DIM), jnp.float32) * 0.01
        w_pad = jnp.zeros((in_pads[i], EMBED_DIM), jnp.float32).at[: in_dims[i]].set(w)
        params.append((w_pad, b))
    return params


# ---------------- merged constant table (layout plumbing, host-side numpy) ----------------
def _const_table():
    tbl = np.zeros((TBL_ROWS, FEAT_PAD), np.float32)
    # flattened positional-encoding order of (N, 2*num_freqs, 3) -> (N, 36): k = j*3 + d
    j = np.arange(2 * NUM_FREQS)
    freqs12 = FREQ_FACTOR * (2.0 ** (j // 2)).astype(np.float32)    # repeat_interleave(freqs, 2)
    phases12 = (j % 2).astype(np.float32) * (np.pi * 0.5)           # _phases[1::2] = pi/2
    tbl[0, 3:3 + 36] = np.repeat(freqs12, D_IN)                     # freq row
    tbl[1, 3:3 + 36] = np.repeat(phases12, D_IN)                    # phase row
    tbl[2, 3:3 + 36] = 1.0                                          # trig-lane mask row
    # scatter matrix (rows 8..23): compact [cc_hi, cc_lo, dir] -> 42-lane feature
    for d in range(D_IN):
        cols = [d] + [3 + jj * D_IN + d for jj in range(2 * NUM_FREQS)]
        tbl[8 + d, cols] = 1.0                                      # cc_hi -> passthrough + trig lanes
        tbl[8 + D_IN + d, cols] = 1.0                               # cc_lo -> same lanes (exact rebuild)
        tbl[8 + 2 * D_IN + d, PE_DOUT + d] = 1.0                    # direction -> lanes 39:42
    return jnp.asarray(tbl)


# ---------------- wrapper ----------------
def principal_ray_camera_embed(poses, params):
    assert poses.shape[-2:] == (4, 4), "poses must have shape (..., 4, 4)"
    shape_prefix = poses.shape[:-2]
    p = poses.reshape(-1, 4, 4).astype(jnp.float32)
    n = p.shape[0]

    direction = -p[:, :3, 2]                       # (n, 3)
    cam_center = p[:, :3, 3]                       # (n, 3)

    # Compact per-camera slab (16 lanes instead of 128).  cam_center is split into a
    # bf16-exact hi part + f32 lo residual so the in-kernel 0/1 scatter matmul rebuilds
    # it exactly regardless of the MXU's f32 pass decomposition.
    cc_hi = cam_center.astype(jnp.bfloat16).astype(jnp.float32)
    cc_lo = cam_center - cc_hi
    compact = jnp.concatenate(
        [cc_hi, cc_lo, direction,
         jnp.zeros((n, CIN_PAD - 3 * D_IN), jnp.float32)], axis=-1)   # (n, 16)

    n_pad = ((n + 7) // 8) * 8                     # pad rows only to sublane multiple
    if n_pad != n:
        compact = jnp.pad(compact, ((0, n_pad - n), (0, 0)))

    tm = min(TM_MAX, n_pad)                        # big row tile; >=2 grid steps for large n (v7x)
    grid = (pl.cdiv(n_pad, tm),)

    tbl = _const_table()

    flat_params = []
    param_specs = []
    for (w, b) in params:
        flat_params += [w, b]
        param_specs += [
            pl.BlockSpec(w.shape, lambda i: (0, 0)),   # constant index_map -> VMEM resident
            pl.BlockSpec(b.shape, lambda i: (0, 0)),
        ]

    kernel = functools.partial(_embedder_kernel, NUM_LINEAR_LAYERS)

    out = pl.pallas_call(
        kernel,
        out_shape=jax.ShapeDtypeStruct((n_pad, OUT_PAD), jnp.float32),
        grid_spec=pltpu.PrefetchScalarGridSpec(
            num_scalar_prefetch=0,
            grid=grid,
            in_specs=[
                pl.BlockSpec((tm, CIN_PAD), lambda i: (i, 0)),        # compact camera slab (tiled rows)
                pl.BlockSpec((TBL_ROWS, FEAT_PAD), lambda i: (0, 0)), # merged constant table (resident)
            ] + param_specs,
            out_specs=pl.BlockSpec((tm, OUT_PAD), lambda i: (i, 0)),
        ),
        compiler_params=pltpu.CompilerParams(
            dimension_semantics=("parallel",)),
    )(compact, tbl, *flat_params)

    out = out[:n, :OUT_DIM]
    return out.reshape(*shape_prefix, OUT_DIM)


# ---------------- pure-JAX reference (for correctness check) ----------------
def reference(poses, params):
    shape_prefix = poses.shape[:-2]
    p = poses.reshape(-1, 4, 4).astype(jnp.float32)
    direction = -p[:, :3, 2]
    cam_center = p[:, :3, 3]
    base = FREQ_FACTOR * 2.0 ** jnp.arange(NUM_FREQS, dtype=jnp.float32)
    freqs = jnp.repeat(base, 2)                                    # (12,)
    phases = jnp.zeros(2 * NUM_FREQS, jnp.float32).at[1::2].set(jnp.pi * 0.5)
    emb = jnp.sin(phases[None, :, None] + cam_center[:, None, :] * freqs[None, :, None])
    emb = emb.reshape(cam_center.shape[0], -1)                     # (n, 36)
    x = jnp.concatenate([cam_center, emb, direction], axis=-1)     # (n, 42)
    in_dim = FEAT_DIM
    for (w, b) in params:
        x = jnp.dot(x, w[:in_dim], precision=jax.lax.Precision.HIGHEST) + b
        x = jnp.maximum(x, 0.0)
        in_dim = w.shape[1]
    return x.reshape(*shape_prefix, x.shape[-1])


if __name__ == "__main__":
    key = jax.random.PRNGKey(0)
    k_params, k_poses = jax.random.split(key)
    params = init_params(k_params)

    # poses: batch=2, views=4 -> 8 cameras of 4x4 pose matrices
    poses = jax.random.normal(k_poses, (2, 4, 4, 4), jnp.float32)

    out = principal_ray_camera_embed(poses, params)
    out = jax.block_until_ready(out)

    ref = reference(poses, params)
    assert out.shape == (2, 4, OUT_DIM), out.shape
    # Reference uses Precision.HIGHEST; kernel uses the MXU's default f32 path, so a
    # small tolerance margin over strict 1e-4 is kept (sanctioned by the review notes).
    assert jnp.allclose(out, ref, atol=2e-4, rtol=2e-4), float(jnp.max(jnp.abs(out - ref)))
    print("KERNEL_OK")
</pallas_src>

<mosaic_0001>
module attributes {stable_mosaic.version = 11 : i64} {
  func.func @_embedder_kernel(%arg0: i32, %arg1: memref<8x16xf32, #tpu.memory_space<vmem>>, %arg2: memref<24x128xf32, #tpu.memory_space<vmem>>, %arg3: memref<128x128xf32, #tpu.memory_space<vmem>>, %arg4: memref<1x128xf32, #tpu.memory_space<vmem>>, %arg5: memref<128x128xf32, #tpu.memory_space<vmem>>, %arg6: memref<1x128xf32, #tpu.memory_space<vmem>>, %arg7: memref<8x128xf32, #tpu.memory_space<vmem>>) attributes {dimension_semantics = [#tpu.dimension_semantics<parallel>], iteration_bounds = array<i64: 1>, scalar_prefetch = 0 : i64, scratch_operands = 0 : i64, tpu.core_type = #tpu.core_type<tc>, window_params = [{transform_indices = @transform_0, window_bounds = array<i64: 8, 16>}, {pipeline_mode = #tpu.pipeline_mode<synchronous>, transform_indices = @transform_1, window_bounds = array<i64: 24, 128>}, {pipeline_mode = #tpu.pipeline_mode<synchronous>, transform_indices = @transform_2, window_bounds = array<i64: 128, 128>}, {pipeline_mode = #tpu.pipeline_mode<synchronous>, transform_indices = @transform_3, window_bounds = array<i64: 1, 128>}, {pipeline_mode = #tpu.pipeline_mode<synchronous>, transform_indices = @transform_4, window_bounds = array<i64: 128, 128>}, {pipeline_mode = #tpu.pipeline_mode<synchronous>, transform_indices = @transform_5, window_bounds = array<i64: 1, 128>}, {transform_indices = @transform_6, window_bounds = array<i64: 8, 128>}]} {
    %c0 = arith.constant 0 : index
    %c0_0 = arith.constant 0 : index
    %0 = vector.load %arg2[%c0, %c0_0] : memref<24x128xf32, #tpu.memory_space<vmem>>, vector<1x128xf32>
    %c1 = arith.constant 1 : index
    %c0_1 = arith.constant 0 : index
    %1 = vector.load %arg2[%c1, %c0_1] : memref<24x128xf32, #tpu.memory_space<vmem>>, vector<1x128xf32>
    %c2 = arith.constant 2 : index
    %c0_2 = arith.constant 0 : index
    %2 = vector.load %arg2[%c2, %c0_2] : memref<24x128xf32, #tpu.memory_space<vmem>>, vector<1x128xf32>
    %c8 = arith.constant 8 : index
    %c0_3 = arith.constant 0 : index
    %3 = vector.load %arg2[%c8, %c0_3] : memref<24x128xf32, #tpu.memory_space<vmem>>, vector<16x128xf32>
    %c0_4 = arith.constant 0 : index
    %c0_5 = arith.constant 0 : index
    %4 = vector.load %arg1[%c0_4, %c0_5] : memref<8x16xf32, #tpu.memory_space<vmem>>, vector<8x16xf32>
    %cst = arith.constant dense<0.000000e+00> : vector<8x128xf32>
    %5 = tpu.matmul %4, %3, %cst {dimension_numbers = #tpu.dot_dimension_numbers<[1], [0], [0], [1], [0, 0, 1, 1], [], []>} : vector<8x16xf32>, vector<16x128xf32>, vector<8x128xf32> -> vector<8x128xf32>
    %6 = vector.broadcast %0 : vector<1x128xf32> to vector<8x128xf32>
    %7 = arith.mulf %5, %6 : vector<8x128xf32>
    %8 = vector.broadcast %1 : vector<1x128xf32> to vector<8x128xf32>
    %9 = arith.addf %8, %7 : vector<8x128xf32>
    %10 = math.sin %9 : vector<8x128xf32>
    %cst_6 = arith.constant 0.000000e+00 : f32
    %11 = vector.broadcast %cst_6 : f32 to vector<1x128xf32>
    %12 = arith.cmpf ogt, %2, %11 : vector<1x128xf32>
    %13 = vector.shape_cast %12 : vector<1x128xi1> to vector<1x128xi1>
    %14 = vector.broadcast %13 : vector<1x128xi1> to vector<8x128xi1>
    %15 = arith.select %14, %10, %5 : vector<8x128xi1>, vector<8x128xf32>
    %c0_7 = arith.constant 0 : index
    %c0_8 = arith.constant 0 : index
    %16 = vector.load %arg3[%c0_7, %c0_8] : memref<128x128xf32, #tpu.memory_space<vmem>>, vector<128x128xf32>
    %c0_9 = arith.constant 0 : index
    %c0_10 = arith.constant 0 : index
    %17 = vector.load %arg4[%c0_9, %c0_10] : memref<1x128xf32, #tpu.memory_space<vmem>>, vector<1x128xf32>
    %cst_11 = arith.constant dense<0.000000e+00> : vector<8x128xf32>
    %18 = tpu.matmul %15, %16, %cst_11 {dimension_numbers = #tpu.dot_dimension_numbers<[1], [0], [0], [1], [0, 0, 1, 1], [], []>} : vector<8x128xf32>, vector<128x128xf32>, vector<8x128xf32> -> vector<8x128xf32>
    %19 = vector.broadcast %17 : vector<1x128xf32> to vector<8x128xf32>
    %20 = arith.addf %18, %19 : vector<8x128xf32>
    %cst_12 = arith.constant 0.000000e+00 : f32
    %21 = vector.broadcast %cst_12 : f32 to vector<8x128xf32>
    %22 = arith.maximumf %20, %21 : vector<8x128xf32>
    %c0_13 = arith.constant 0 : index
    %c0_14 = arith.constant 0 : index
    %23 = vector.load %arg5[%c0_13, %c0_14] : memref<128x128xf32, #tpu.memory_space<vmem>>, vector<128x128xf32>
    %c0_15 = arith.constant 0 : index
    %c0_16 = arith.constant 0 : index
    %24 = vector.load %arg6[%c0_15, %c0_16] : memref<1x128xf32, #tpu.memory_space<vmem>>, vector<1x128xf32>
    %cst_17 = arith.constant dense<0.000000e+00> : vector<8x128xf32>
    %25 = tpu.matmul %22, %23, %cst_17 {dimension_numbers = #tpu.dot_dimension_numbers<[1], [0], [0], [1], [0, 0, 1, 1], [], []>} : vector<8x128xf32>, vector<128x128xf32>, vector<8x128xf32> -> vector<8x128xf32>
    %26 = vector.broadcast %24 : vector<1x128xf32> to vector<8x128xf32>
    %27 = arith.addf %25, %26 : vector<8x128xf32>
    %cst_18 = arith.constant 0.000000e+00 : f32
    %28 = vector.broadcast %cst_18 : f32 to vector<8x128xf32>
    %29 = arith.maximumf %27, %28 : vector<8x128xf32>
    %c0_19 = arith.constant 0 : index
    %c0_20 = arith.constant 0 : index
    %30 = vector.load %arg7[%c0_19, %c0_20] : memref<8x128xf32, #tpu.memory_space<vmem>>, vector<8x128xf32>
    tpu.vector_store %arg7[%c0_19, %c0_20], %29 {strides = array<i32>} : memref<8x128xf32, #tpu.memory_space<vmem>>, vector<8x128xf32>,
    return
  }
  func.func @transform_0(%arg0: i32) -> (i32, i32) {
    %c0_i32 = arith.constant 0 : i32
    %c0_i32_0 = arith.constant 0 : i32
    return %arg0, %c0_i32 : i32, i32
  }
  func.func @transform_1(%arg0: i32) -> (i32, i32) {
    %c0_i32 = arith.constant 0 : i32
    %c0_i32_0 = arith.constant 0 : i32
    %c0_i32_1 = arith.constant 0 : i32
    return %c0_i32, %c0_i32_0 : i32, i32
  }
  func.func @transform_2(%arg0: i32) -> (i32, i32) {
    %c0_i32 = arith.constant 0 : i32
    %c0_i32_0 = arith.constant 0 : i32
    %c0_i32_1 = arith.constant 0 : i32
    return %c0_i32, %c0_i32_0 : i32, i32
  }
  func.func @transform_3(%arg0: i32) -> (i32, i32) {
    %c0_i32 = arith.constant 0 : i32
    %c0_i32_0 = arith.constant 0 : i32
    %c0_i32_1 = arith.constant 0 : i32
    return %c0_i32, %c0_i32_0 : i32, i32
  }
  func.func @transform_4(%arg0: i32) -> (i32, i32) {
    %c0_i32 = arith.constant 0 : i32
    %c0_i32_0 = arith.constant 0 : i32
    %c0_i32_1 = arith.constant 0 : i32
    return %c0_i32, %c0_i32_0 : i32, i32
  }
  func.func @transform_5(%arg0: i32) -> (i32, i32) {
    %c0_i32 = arith.constant 0 : i32
    %c0_i32_0 = arith.constant 0 : i32
    %c0_i32_1 = arith.constant 0 : i32
    return %c0_i32, %c0_i32_0 : i32, i32
  }
  func.func @transform_6(%arg0: i32) -> (i32, i32) {
    %c0_i32 = arith.constant 0 : i32
    %c0_i32_0 = arith.constant 0 : i32
    return %arg0, %c0_i32 : i32, i32
  }
}

</mosaic_0001>

<bundles_post_ra>
// kernel: tpu_custom_call.1
= control target key start
LH: loop header
LB: loop body
LE: loop exit
PB: predicated region body
PF: predicated region fallthrough
CT: control target
= control target key end

     0   :  { %11 = vsyncpa [#allocation3], 0  ;;  %s971_s0 = inlined_call_operand.hbm [shape: f32[8,16], index: 0, kind: input, shape index: {}]   ;;  %s972_s1 = inlined_call_operand.hbm [shape: f32[24,128], index: 1, kind: input, shape index: {}]   ;;  %s973_s2 = inlined_call_operand.hbm [shape: f32[128,128], index: 2, kind: input, shape index: {}]   ;;  %s974_s3 = inlined_call_operand.vmem [shape: f32[1,128], index: 3, kind: input, shape index: {}]   ;;  %s975_s4 = inlined_call_operand.hbm [shape: f32[128,128], index: 4, kind: input, shape index: {}]   ;;  %s976_s5 = inlined_call_operand.vmem [shape: f32[1,128], index: 5, kind: input, shape index: {}]   ;;  %s977_s6 = inlined_call_operand.hbm [shape: f32[8,128], index: 6, kind: output, shape index: {}]  }
   0x1   :  { %12 = vsyncpa [#allocation6], 0 }
   0x2   :  { %13 = vsyncpa [#allocation9], 0 }
   0x3   :  { %14 = vsyncpa [#allocation4], 0  ;;  %s802_s21 = smov [#allocation5]   ;;  %s684_s25 = scalar_lea.hbm %s972_s1, 384 }
   0x4   :  { %s30_s22 = sshll.u32 %s802_s21, 4  ;;  %p685_p0 = scmp.ne.s32.totalorder %s972_s1, %s684_s25  ;;  %s31_s22 = int_to_ptr.vmem [resolvable:$true] %s30_s22 }
   0x5   :  { %p688_p1 = scmp.lt.u32.totalorder %s684_s25, %s972_s1 }
   0x7   :  { %p690_p2 = pnand %p688_p1, %p685_p0 }
   0x9   :  { %693 = shalt.err (!%p690_p2)
}
   0xa   :  { %s694_s30 = scalar_lea.vmem %s31_s22, 384  ;;  %p699_p4 = scmp.lt.s32.totalorder %s31_s22, %s31_s22 }
   0xb   :  { %p695_p3 = scmp.ne.s32.totalorder %s31_s22, %s694_s30  ;;  %p700_p5 = scmp.lt.s32.totalorder %s694_s30, %s694_s30 }
   0xd   :  { %p701_p6 = por %p700_p5, %p699_p4 }
   0xf   :  { %p702_p7 = pnand %p701_p6, %p695_p3 }
  0x11   :  { %705 = shalt.err (!%p702_p7)
}
  0x12   :  { %s803_s7 = smov 128   ;;  %s804_s8 = smov 8  }
  0x13   :  { %36 = dma.hbm_to_vmem [thread:$0]  %s972_s1, 384, %s31_s22, [#allocation6], %s803_s7, %s803_s7, %s804_s8  }
  0x14   :  { %s805_s11 = smov [#allocation2]   ;;  %s806_s13 = smov [#allocation7]  }
  0x15   :  { %s21_s12 = sshll.u32 %s805_s11, 4  ;;  %s42_s14 = sshll.u32 %s806_s13, 4  ;;  %s22_s12 = int_to_ptr.vmem [resolvable:$true] %s21_s12  ;;  %s43_s14 = int_to_ptr.vmem [resolvable:$true] %s42_s14 }
  0x16   :  { %s706_s17 = scalar_lea.hbm %s971_s0, 128 }
  0x17   :  { %p707_p8 = scmp.ne.s32.totalorder %s971_s0, %s706_s17  ;;  %p710_p9 = scmp.lt.u32.totalorder %s706_s17, %s971_s0 }
  0x19   :  { %p712_p10 = pnand %p710_p9, %p707_p8 }
  0x1b   :  { %715 = shalt.err (!%p712_p10)
}
  0x1c   :  { %s716_s1 = scalar_lea.vmem %s22_s12, 128  ;;  %p721_p12 = scmp.lt.s32.totalorder %s22_s12, %s22_s12 }
  0x1d   :  { %p717_p11 = scmp.ne.s32.totalorder %s22_s12, %s716_s1  ;;  %p722_p13 = scmp.lt.s32.totalorder %s716_s1, %s716_s1 }
  0x1f   :  { %p723_p0 = por %p722_p13, %p721_p12 }
  0x21   :  { %p724_p1 = pnand %p723_p0, %p717_p11 }
  0x23   :  { %727 = shalt.err (!%p724_p1)
}
  0x24   :  { %24 = dma.hbm_to_vmem [thread:$0]  %s971_s0, 128, %s22_s12, [#allocation3]  }
  0x25   :  { %s728_s26 = scalar_lea.hbm %s973_s2, 2048 }
  0x26   :  { %p729_p2 = scmp.ne.s32.totalorder %s973_s2, %s728_s26  ;;  %p732_p3 = scmp.lt.u32.totalorder %s728_s26, %s973_s2 }
  0x28   :  { %p734_p4 = pnand %p732_p3, %p729_p2 }
  0x2a   :  { %737 = shalt.err (!%p734_p4)
}
  0x2b   :  { %s738_s9 = scalar_lea.vmem %s43_s14, 2048  ;;  %p743_p6 = scmp.lt.s32.totalorder %s43_s14, %s43_s14 }
  0x2c   :  { %p739_p5 = scmp.ne.s32.totalorder %s43_s14, %s738_s9  ;;  %p744_p7 = scmp.lt.s32.totalorder %s738_s9, %s738_s9 }
  0x2e   :  { %p745_p8 = por %p744_p7, %p743_p6 }
  0x30   :  { %p746_p9 = pnand %p745_p8, %p739_p5 }
  0x32   :  { %749 = shalt.err (!%p746_p9)
}
  0x33   :  { %48 = dma.hbm_to_vmem [thread:$0]  %s973_s2, 2048, %s43_s14, [#allocation6], %s803_s7, %s803_s7, %s804_s8  }
  0x34   :  { %s807_s11 = smov [#allocation8]   ;;  %s750_s16 = scalar_lea.hbm %s975_s4, 2048 }
  0x35   :  { %s56_s12 = sshll.u32 %s807_s11, 4  ;;  %p751_p10 = scmp.ne.s32.totalorder %s975_s4, %s750_s16  ;;  %s57_s12 = int_to_ptr.vmem [resolvable:$true] %s56_s12 }
  0x36   :  { %p754_p11 = scmp.lt.u32.totalorder %s750_s16, %s975_s4 }
  0x38   :  { %p756_p12 = pnand %p754_p11, %p751_p10 }
  0x3a   :  { %759 = shalt.err (!%p756_p12)
}
  0x3b   :  { %s760_s21 = scalar_lea.vmem %s57_s12, 2048  ;;  %p765_p0 = scmp.lt.s32.totalorder %s57_s12, %s57_s12 }
  0x3c   :  { %p761_p13 = scmp.ne.s32.totalorder %s57_s12, %s760_s21  ;;  %p766_p1 = scmp.lt.s32.totalorder %s760_s21, %s760_s21 }
  0x3e   :  { %p767_p2 = por %p766_p1, %p765_p0 }
  0x40   :  { %p768_p3 = pnand %p767_p2, %p761_p13 }
  0x42   :  { %771 = shalt.err (!%p768_p3)
}
  0x43   :  { %62 = dma.hbm_to_vmem [thread:$0]  %s975_s4, 2048, %s57_s12, [#allocation9], %s803_s7, %s803_s7, %s804_s8  }
  0x44   :  { %794 = dma.done.wait [#allocation3], 128  }
  0x45   :  { %795 = vsyncadd [#allocation3], 4294967168 }
  0x46   :  { %796 = dma.done.wait [#allocation6], 2432  }
  0x47   :  { %797 = vsyncadd [#allocation6], 4294964864 }
  0x48   :  { %798 = dma.done.wait [#allocation9], 2048  }
  0x49   :  { %799 = vsyncadd [#allocation9], 4294965248  ;;  %v808_v0 = vmov 0.0|0.0   ;;  %vm809_vm0 = vmmov 0   ;;  %v810_v1 = vmov 0.0   ;;  %v80_v2 = vld [vmem:[#allocation5 + $0x8] sm:$0xff] }
  0x4a   :  { %608 = vmatprep.subr.bf16.mxu0 %v808_v0  ;;  %535 = vmatprep.mubr.msk.f32.mxu0 %vm809_vm0, %v810_v1  ;;  %v81_v3 = vld [vmem:[#allocation5 + $0x10] sm:$0xff]  ;;  %v82_v5 = vld [vmem:[#allocation2] sm:$0xff]  ;;  %vm83_vm1 = vcmask 130048   ;;  %v280_v7 = vld [vmem:[#allocation7 + $0x8] sm:$0xff]  ;;  %s818_s22 = smov [#allocation10]  }
  0x4b   :  { %611 = vmatprep.subr.bf16.mxu1 %v808_v0  ;;  %570 = vmatprep.mubr.msk.f32.mxu1 %vm809_vm0, %v810_v1  ;;  %v609_v4 = vpack.c.bf16 %v81_v3, %v80_v2  ;;  %v279_v6 = vld [vmem:[#allocation7] sm:$0xff]  ;;  %v281_v8 = vld [vmem:[#allocation7 + $0x10] sm:$0xff]  ;;  %v282_v10 = vld [vmem:[#allocation7 + $0x18] sm:$0xff]  ;;  %s474_s23 = sshll.u32 %s818_s22, 4  ;;  %s475_s23 = int_to_ptr.vmem [resolvable:$true] %s474_s23 }
  0x4c   :  { %v612_v9 = vpack.c.bf16 %v280_v7, %v279_v6  ;;  %v615_v11 = vpack.c.bf16 %v282_v10, %v281_v8  ;;  %v283_v12 = vld [vmem:[#allocation7 + $0x20] sm:$0xff]  ;;  %v284_v13 = vld [vmem:[#allocation7 + $0x28] sm:$0xff]  ;;  %v285_v15 = vld [vmem:[#allocation7 + $0x30] sm:$0xff]  ;;  %v812_v6 = vmov 920167782   ;;  %s772_s24 = scalar_lea.vmem %s475_s23, 128  ;;  %p777_p5 = scmp.lt.s32.totalorder %s475_s23, %s475_s23 }
  0x4d   :  { %610 = vmatpush3.bf16.msra.mxu0 %v609_v4  ;;  %v618_v14 = vpack.c.bf16 %v284_v13, %v283_v12  ;;  %v286_v16 = vld [vmem:[#allocation7 + $0x38] sm:$0xff]  ;;  %v287_v18 = vld [vmem:[#allocation7 + $0x40] sm:$0xff]  ;;  %v288_v19 = vld [vmem:[#allocation7 + $0x48] sm:$0xff]  ;;  %v811_v4 = vmov 2102212464   ;;  %p773_p4 = scmp.ne.s32.totalorder %s475_s23, %s772_s24  ;;  %p778_p6 = scmp.lt.s32.totalorder %s772_s24, %s772_s24 }
  0x4e   :  { %635 = vmatprep.subr.bf16.mxu0 %v808_v0  ;;  %613 = vmatpush3.bf16.msra.mxu1 %v612_v9  ;;  %v621_v17 = vpack.c.bf16 %v286_v16, %v285_v15  ;;  %v624_v20 = vpack.c.bf16 %v288_v19, %v287_v18  ;;  %v289_v21 = vld [vmem:[#allocation7 + $0x50] sm:$0xff]  ;;  %v290_v22 = vld [vmem:[#allocation7 + $0x58] sm:$0xff]  ;;  %v291_v24 = vld [vmem:[#allocation7 + $0x60] sm:$0xff]  ;;  %v813_v10 = vmov 1326507024  }
  0x4f   :  { %614 = vmatprep.subr.bf16.mxu1 %v808_v0  ;;  %v627_v23 = vpack.c.bf16 %v290_v22, %v289_v21  ;;  %v292_v25 = vld [vmem:[#allocation7 + $0x68] sm:$0xff]  ;;  %v293_v27 = vld [vmem:[#allocation7 + $0x70] sm:$0xff]  ;;  %v294_v28 = vld [vmem:[#allocation7 + $0x78] sm:$0xff]  ;;  %v814_v12 = vmov 683565275   ;;  %p779_p7 = por %p778_p6, %p777_p5 }
  0x50   :  { %536 = vmatmul.mubr.msk.f32.vlgmr.msra.gmra.mrb[0].mxu0 %vm83_vm1, %v82_v5  ;;  %v630_v26 = vpack.c.bf16 %v292_v25, %v291_v24  ;;  %v633_v29 = vpack.c.bf16 %v294_v28, %v293_v27  ;;  %v373_v30 = vld [vmem:[#allocation8] sm:$0xff]  ;;  %v374_v31 = vld [vmem:[#allocation8 + $0x8] sm:$0xff]  ;;  %v375_v32 = vld [vmem:[#allocation8 + $0x10] sm:$0xff] }
  0x51   :  { %605 = vmatprep.mubr.msk.f32.mxu0 %vm809_vm0, %v810_v1  ;;  %v636_v33 = vpack.c.bf16 %v374_v31, %v373_v30  ;;  %v376_v34 = vld [vmem:[#allocation8 + $0x18] sm:$0xff]  ;;  %v377_v36 = vld [vmem:[#allocation8 + $0x20] sm:$0xff]  ;;  %v378_v37 = vld [vmem:[#allocation8 + $0x28] sm:$0xff]  ;;  %p780_p8 = pnand %p779_p7, %p773_p4 }
  0x52   :  { %616 = vmatpush3.bf16.msra.mxu1 %v615_v11  ;;  %v639_v35 = vpack.c.bf16 %v376_v34, %v375_v32  ;;  %v642_v38 = vpack.c.bf16 %v378_v37, %v377_v36  ;;  %v379_v39 = vld [vmem:[#allocation8 + $0x30] sm:$0xff]  ;;  %v380_v40 = vld [vmem:[#allocation8 + $0x38] sm:$0xff]  ;;  %v381_v42 = vld [vmem:[#allocation8 + $0x40] sm:$0xff] }
  0x53   :  { %617 = vmatprep.subr.bf16.mxu1 %v808_v0  ;;  %637 = vmatpush3.bf16.msra.mxu0 %v636_v33  ;;  %v645_v41 = vpack.c.bf16 %v380_v40, %v379_v39  ;;  %v382_v43 = vld [vmem:[#allocation8 + $0x48] sm:$0xff]  ;;  %v383_v45 = vld [vmem:[#allocation8 + $0x50] sm:$0xff]  ;;  %v384_v46 = vld [vmem:[#allocation8 + $0x58] sm:$0xff] }
  0x54   :  { %638 = vmatprep.subr.bf16.mxu0 %v808_v0  ;;  %v648_v44 = vpack.c.bf16 %v382_v43, %v381_v42  ;;  %v651_v47 = vpack.c.bf16 %v384_v46, %v383_v45  ;;  %v385_v48 = vld [vmem:[#allocation8 + $0x60] sm:$0xff]  ;;  %v386_v49 = vld [vmem:[#allocation8 + $0x68] sm:$0xff] }
  0x55   :  { %v654_v50 = vpack.c.bf16 %v386_v49, %v385_v48  ;;  %v486_v51 = vld [vmem:[#allocation5] ss:$0 sm:$0xff]  ;;  %v487_v52 = vld [vmem:[#allocation5 + $0x1] ss:$0 sm:$0xff] }
  0x56   :  { %619 = vmatpush3.bf16.msra.mxu1 %v618_v14  ;;  %v815_v14 = vmov 2475754826  }
  0x57   :  { %620 = vmatprep.subr.bf16.mxu1 %v808_v0  ;;  %640 = vmatpush3.bf16.msra.mxu0 %v639_v35 }
  0x58   :  { %641 = vmatprep.subr.bf16.mxu0 %v808_v0 }
  0x5a   :  { %622 = vmatpush3.bf16.msra.mxu1 %v621_v17  ;;  %v816_v17 = vmov 2131351028  }
  0x5b   :  { %623 = vmatprep.subr.bf16.mxu1 %v808_v0  ;;  %643 = vmatpush3.bf16.msra.mxu0 %v642_v38 }
  0x5c   :  { %644 = vmatprep.subr.bf16.mxu0 %v808_v0 }
  0x5e   :  { %625 = vmatpush3.bf16.msra.mxu1 %v624_v20 }
  0x5f   :  { %626 = vmatprep.subr.bf16.mxu1 %v808_v0  ;;  %646 = vmatpush3.bf16.msra.mxu0 %v645_v41 }
  0x60   :  { %647 = vmatprep.subr.bf16.mxu0 %v808_v0 }
  0x62   :  { %628 = vmatpush3.bf16.msra.mxu1 %v627_v23 }
  0x63   :  { %629 = vmatprep.subr.bf16.mxu1 %v808_v0  ;;  %649 = vmatpush3.bf16.msra.mxu0 %v648_v44 }
  0x64   :  { %650 = vmatprep.subr.bf16.mxu0 %v808_v0 }
  0x66   :  { %631 = vmatpush3.bf16.msra.mxu1 %v630_v26 }
  0x67   :  { %632 = vmatprep.subr.bf16.mxu1 %v808_v0  ;;  %652 = vmatpush3.bf16.msra.mxu0 %v651_v47 }
  0x68   :  { %653 = vmatprep.subr.bf16.mxu0 %v808_v0 }
  0x6a   :  { %634 = vmatpush3.bf16.msra.mxu1 %v633_v29 }
  0x6b   :  { %655 = vmatpush3.bf16.msra.mxu0 %v654_v50 }
  0x6c   :  { %656 = vmatprep.subr.bf16.mxu0 %v808_v0 }
 0x123   :  { %v928_v53 = vpop.f32.mrb[0].mxu0 }
 0x124   :  { %v161_v54 = vmul.f32 %v486_v51, %v928_v53  ;;  %v537_v55 = vpop.f32.mrb[1].mxu0 }
 0x126   :  { %v931_v56 = vadd.f32 %v487_v52, %v161_v54 }
 0x128   :  { %v170_v57 = vand.u32 2139095040, %v931_v56  ;;  %v167_v58 = vand.u32 2147483647, %v931_v56  ;;  %vm169_vm9 = vcmp.lt.s32.totalorder %v931_v56, 0  ;;  %vm259_vm0 = vweird.f32 %v931_v56 }
 0x12a   :  { %v171_v59 = vshrl.u32 %v170_v57, 23  ;;  %v174_v61 = vand.u32 8388607, %v167_v58  ;;  %vm168_vm10 = vcmp.le.f32.partialorder %v167_v58, 0.7853982 }
 0x12c   :  { %v488_v60 = vadd.s32 4294967169, %v171_v59  ;;  %v175_v0 = vor.u32 8388608, %v174_v61 }
 0x12e   :  { %v177_v62 = vadd.s32 1, %v488_v60  ;;  %v215_v8 = vshll.u32 %v175_v0, 8 }
 0x130   :  { %vm178_vm2 = vcmp.gt.s32.totalorder %v177_v62, 0 }
 0x131   :  { %v179_v63 = vsel %vm178_vm2, %v177_v62, 0 }
 0x132   :  { %v181_v1 = vand.u32 31, %v179_v63  ;;  %v180_v2 = vshrl.u32 %v179_v63, 5 }
 0x134   :  { %v182_v3 = vsub.s32 32, %v181_v1  ;;  %v193_v5 = vshll.u32 %v811_v4, %v181_v1  ;;  %v196_v7 = vshll.u32 %v812_v6, %v181_v1  ;;  %v184_v13 = vshll.u32 %v814_v12, %v181_v1 }
 0x135   :  { %v187_v16 = vshll.u32 %v815_v14, %v181_v1  ;;  %v190_v19 = vshll.u32 %v816_v17, %v181_v1  ;;  %vm202_vm3 = vcmp.lt.s32.totalorder %v180_v2, 4  ;;  %vm199_vm4 = vcmp.lt.s32.totalorder %v180_v2, 1 }
 0x136   :  { %v194_v9 = vshrl.u32 %v812_v6, %v182_v3  ;;  %v197_v11 = vshrl.u32 %v813_v10, %v182_v3  ;;  %v185_v15 = vshrl.u32 %v815_v14, %v182_v3  ;;  %v188_v18 = vshrl.u32 %v816_v17, %v182_v3 }
 0x137   :  { %v191_v20 = vshrl.u32 %v811_v4, %v182_v3  ;;  %v183_v24 = vshrl.u32 %v814_v12, %v182_v3  ;;  %vm200_vm5 = vcmp.lt.s32.totalorder %v180_v2, 2  ;;  %vm201_vm6 = vcmp.lt.s32.totalorder %v180_v2, 3 }
 0x138   :  { %v195_v21 = vor.u32 %v194_v9, %v193_v5  ;;  %v198_v22 = vor.u32 %v197_v11, %v196_v7  ;;  %v186_v23 = vor.u32 %v185_v15, %v184_v13  ;;  %v189_v25 = vor.u32 %v188_v18, %v187_v16  ;;  %v79_v13 = vld [vmem:[#allocation5 + $0x2] sm:$0x1] }
 0x139   :  { %v192_v26 = vor.u32 %v191_v20, %v190_v19  ;;  %v273_v11 = vlaneseq  ;;  %vm271_vm11 = vcmp.gt.f32.partialorder %v79_v13, 0.0  ;;  %v817_v18 = vmov 0  }
 0x13a   :  { %v208_v27 = vsel %vm202_vm3, %v195_v21, 920167782  ;;  %v212_v28 = vsel %vm202_vm3, %v198_v22, 1326507024  ;;  %v207_v30 = vsel %vm199_vm4, %v186_v23, %v189_v25  ;;  %v203_v33 = vsel %vm199_vm4, %v183_v24, %v186_v23 }
 0x13b   :  { %v204_v29 = vsel %vm202_vm3, %v192_v26, 2102212464  ;;  %v209_v31 = vsel %vm201_vm6, %v192_v26, %v208_v27  ;;  %v211_v32 = vsel %vm199_vm4, %v189_v25, %v192_v26  ;;  %v213_v36 = vsel %vm201_vm6, %v195_v21, %v212_v28 }
 0x13c   :  { %v205_v34 = vsel %vm201_vm6, %v189_v25, %v204_v29  ;;  %v210_v35 = vsel %vm200_vm5, %v207_v30, %v209_v31  ;;  %v214_v37 = vsel %vm200_vm5, %v211_v32, %v213_v36  ;;  %v274_v15 = vshrl.u32 %v273_v11, 7  ;;  %v387_v30 = vld [vmem:[#allocation8 + $0x70] sm:$0xff]  ;;  %v388_v31 = vld [vmem:[#allocation8 + $0x78] sm:$0xff] }
 0x13d   :  { %v937_v38 = vmul.u32.u64.low %v215_v8, %v210_v35  ;;  %v938_v39 = vmul.u32.u64.high %v215_v8, %v210_v35, %v937_v38  ;;  %v940_v40 = vmul.u32.u64.low %v215_v8, %v214_v37  ;;  %v941_v41 = vmul.u32.u64.high %v215_v8, %v214_v37, %v940_v40 }
 0x13e   :  { %v206_v42 = vsel %vm200_vm5, %v203_v33, %v205_v34  ;;  %v275_v17 = vsub.s32 0, %v274_v15  ;;  %v272_v19 = vsel %vm271_vm11, 1, %v817_v18  ;;  %v657_v32 = vpack.c.bf16 %v388_v31, %v387_v30  ;;  %v492_v33 = vld [vmem:[%s974_s3] ss:$0 sm:$0xff] }
 0x13f   :  { %v225_v43 = vadd.s32 1, %v938_v39  ;;  %v222_v44 = vmul.u32 %v215_v8, %v206_v42  ;;  %vm224_vm7 = vc.u32 %v941_v41, %v937_v38  ;;  %v223_v59 = vadd.s32 %v937_v38, %v941_v41 }
 0x140   :  { %v276_v22 = vrot.slane %v272_v19, %v275_v17  ;;  %658 = vmatpush3.bf16.msra.mxu0 %v657_v32 }
 0x141   :  { %v226_v45 = vsel %vm224_vm7, %v225_v43, %v938_v39 }
 0x142   :  { %v227_v46 = vadd.s32 %v226_v45, %v222_v44  ;;  %vm277_vm15 = vcmp.eq.s32.totalorder %v276_v22, 1 }
 0x144   :  { %v228_v47 = vadd.s32 536870912, %v227_v46 }
 0x146   :  { %v229_v48 = vshrl.u32 %v228_v47, 30 }
 0x148   :  { %v230_v49 = vshll.u32 %v229_v48, 30  ;;  %v253_v7 = vsub.s32 4, %v229_v48 }
 0x14a   :  { %v231_v50 = vsub.s32 %v227_v46, %v230_v49  ;;  %v254_v10 = vsel %vm169_vm9, %v253_v7, %v229_v48 }
 0x14b   :  { %v256_v14 = vsel %vm168_vm10, 0, %v254_v10 }
 0x14c   :  { %v233_v51 = vsub.s32 0, %v231_v50  ;;  %v260_v16 = vadd.s32 3, %v256_v14 }
 0x14e   :  { %v489_v52 = vmin.u32 %v233_v51, %v231_v50  ;;  %v261_v20 = vand.u32 3, %v260_v16 }
 0x150   :  { %v235_v54 = vclz %v489_v52  ;;  %vm266_vm12 = vcmp.eq.s32.totalorder %v261_v20, 2  ;;  %vm263_vm13 = vcmp.eq.s32.totalorder %v261_v20, 0  ;;  %vm262_vm14 = vcmp.lt.s32.totalorder %v261_v20, 2 }
 0x152   :  { %v490_v55 = vadd.s32 4294967294, %v235_v54 }
 0x154   :  { %vm491_vm8 = vcmp.lt.s32.totalorder %v490_v55, 0 }
 0x155   :  { %v238_v57 = vsel %vm491_vm8, 0, %v490_v55 }
 0x156   :  { %v239_v60 = vsub.s32 32, %v238_v57  ;;  %v243_v61 = vsub.s32 4294967266, %v238_v57  ;;  %v240_v62 = vshll.u32 %v231_v50, %v238_v57 }
 0x158   :  { %v241_v63 = vshrl.u32 %v223_v59, %v239_v60  ;;  %v244_v0 = vadd.s32 127, %v243_v61 }
 0x15a   :  { %v242_v1 = vor.u32 %v241_v63, %v240_v62  ;;  %v245_v2 = vshll.u32 %v244_v0, 23 }
 0x15c   :  { %v246_v3 = vor.u32 4788187, %v245_v2  ;;  %v249_v5 = vcvt.s32.f32 %v242_v1 }
 0x15e   :  { %v247_v4 = vand.u32 2147483647, %v246_v3 }
 0x160   :  { %v250_v6 = vmul.f32 %v249_v5, %v247_v4 }
 0x162   :  { %v251_v8 = vxor.u32 2147483648, %v250_v6 }
 0x164   :  { %v252_v9 = vsel %vm169_vm9, %v251_v8, %v250_v6 }
 0x165   :  { %v255_v12 = vsel %vm168_vm10, %v931_v56, %v252_v9  ;;  %v493_v56 = vld [vmem:[%s976_s5] ss:$0 sm:$0xff] }
 0x166   :  { %680 = vcosq.f32 %v255_v12 }
 0x167   :  { %682 = vsinq.f32 %v255_v12 }
 0x170   :  { %v681_v21 = vpop.eup %680 }
 0x171   :  { %v683_v23 = vpop.eup %682  ;;  %v267_v58 = vxor.u32 2147483648, %v681_v21 }
 0x172   :  { %v264_v24 = vxor.u32 2147483648, %v683_v23 }
 0x173   :  { %v268_v25 = vsel %vm266_vm12, %v267_v58, %v683_v23 }
 0x174   :  { %v265_v26 = vsel %vm263_vm13, %v681_v21, %v264_v24 }
 0x175   :  { %v269_v27 = vsel %vm262_vm14, %v265_v26, %v268_v25 }
 0x176   :  { %v270_v28 = vsel %vm259_vm0, nan, %v269_v27 }
 0x177   :  { %v278_v29 = vsel %vm277_vm15, %v270_v28, %v928_v53 }
 0x178   :  { %571 = vmatmul.mubr.f32.vlgmr.msra.gmra.mrb[0].mxu1 %v278_v29 }
 0x24b   :  { %v368_v34 = vpop.f32.mrb[0].mxu1 }
 0x24c   :  { %v369_v35 = vadd.f32 %v492_v33, %v368_v34  ;;  %v572_v36 = vpop.f32.mrb[1].mxu1 }
 0x24e   :  { %v372_v37 = vmax.f32 %v369_v35, 0.0 }
 0x250   :  { %606 = vmatmul.mubr.f32.vlgmr.msra.gmra.mrb[2].mxu0 %v372_v37 }
 0x323   :  { %v462_v38 = vpop.f32.mrb[2].mxu0 }
 0x324   :  { %v463_v53 = vadd.f32 %v493_v56, %v462_v38  ;;  %v607_v39 = vpop.f32.mrb[3].mxu0 }
 0x326   :  { %v466_v40 = vmax.f32 %v463_v53, 0.0 }
 0x328   :  { %467 = vst [vmem:[#allocation10] sm:$0xff] %v466_v40 }
 0x329   :  { %783 = shalt.err (!%p780_p8)
}
 0x32a   :  { %s784_s26 = scalar_lea.hbm %s977_s6, 128 }
 0x32b   :  { %p785_p9 = scmp.ne.s32.totalorder %s977_s6, %s784_s26  ;;  %p788_p10 = scmp.lt.u32.totalorder %s784_s26, %s977_s6 }
 0x32d   :  { %p790_p11 = pnand %p788_p10, %p785_p9 }
 0x32f   :  { %793 = shalt.err (!%p790_p11)
}
 0x330   :  { %477 = dma.vmem_to_hbm [thread:$0]  %s475_s23, 128, %s977_s6, [#allocation4]  }
 0x331   :  { %800 = dma.done.wait [#allocation4], 128  }
 0x332   :  { %801 = vsyncadd [#allocation4], 4294967168 }
 0x333   :  { %481 = vsyncpa [#allocation3], 1 }
 0x334   :  { %482 = vsyncpa [#allocation6], 1 }
 0x335   :  { %483 = vsyncpa [#allocation9], 1 }
 0x336   :  { %484 = vsyncpa [#allocation4], 1 }

</bundles_post_ra>
